<compile_context>
chip_gen: v7x
topology: tpu7x:2x2x1
jax: 0.10.0
libtpu: 0.0.40
codegen_flags: <defaults>
</compile_context>

<pallas_src>
import math
import functools

import jax
import jax.numpy as jnp
from jax.experimental import pallas as pl
from jax.experimental.pallas import tpu as pltpu


def _build_pe(seq_len: int, d_model: int) -> jnp.ndarray:
    """Deterministic sinusoidal PE table, identical to the torch __init__."""
    position = jnp.arange(0, seq_len, dtype=jnp.float32)[:, None]            # (S, 1)
    div_term = jnp.exp(
        jnp.arange(0, d_model, 2, dtype=jnp.float32) * (-math.log(10000.0) / d_model)
    )                                                                        # (D/2,)
    pe = jnp.zeros((seq_len, d_model), dtype=jnp.float32)
    pe = pe.at[:, 0::2].set(jnp.sin(position * div_term))
    pe = pe.at[:, 1::2].set(jnp.cos(position * div_term))
    return pe                                                                # (S, D)


def _largest_divisor_tile(full: int, unit: int, max_tile: int) -> int:
    """Largest t <= max_tile with t % unit == 0 and full % t == 0; else `full`.

    Returning `full` is always legal: a block dim equal to the full array dim
    satisfies the (8, 128) divisibility rule.
    """
    best = 0
    t = unit
    cap = min(full, max_tile)
    while t <= cap:
        if full % t == 0:
            best = t
        t += unit
    return best if best > 0 else full


def _make_kernel(use_dropout: bool):
    if use_dropout:
        def kernel(x_ref, pe_ref, m_ref, o_ref):
            # x_ref/m_ref/o_ref: (TR, TC); pe_ref: (1, TC) broadcast over sublanes.
            # Mask is pre-scaled to {0, 1/keep} so this is a single VPU multiply.
            o_ref[...] = (x_ref[...] + pe_ref[...]) * m_ref[...]
    else:
        def kernel(x_ref, pe_ref, o_ref):
            o_ref[...] = x_ref[...] + pe_ref[...]
    return kernel


@functools.partial(jax.jit, static_argnames=("dropout_p", "training"))
def positional_encoding(x, pe, key, *, dropout_p: float = 0.0, training: bool = False):
    """x: (B, S, D); pe: (S_max, D) with S_max >= S; key: jax PRNG key (dropout)."""
    B, S, D = x.shape
    C = S * D

    # Lane-dense 2-D view: last dim is S*D (multiple of 128 for typical configs).
    x2 = x.reshape(B, C)
    pe2 = pe[:S, :].reshape(1, C).astype(x.dtype)      # == self.pe[:, :x.shape[1], :]

    use_dropout = bool(training) and float(dropout_p) > 0.0

    # ~2 MiB f32 tiles: big enough for >=85% of HBM roofline, small enough that
    # (2x in + 2x out [+ 2x mask]) double-buffered stays under v5e's 16 MiB
    # default scoped VMEM (and far under v7x's 32 MiB scoped / 64 MiB physical).
    itemsize = jnp.dtype(x.dtype).itemsize
    tile_c = _largest_divisor_tile(C, 128, 8192)
    max_rows = max(1, (2 * 1024 * 1024) // (tile_c * itemsize))
    tile_r = _largest_divisor_tile(B, 8, max_rows)

    grid = (B // tile_r, C // tile_c)

    x_spec = pl.BlockSpec((tile_r, tile_c), lambda i, j: (i, j))
    pe_spec = pl.BlockSpec((1, tile_c), lambda i, j: (0, j))   # broadcast over batch rows
    out_spec = pl.BlockSpec((tile_r, tile_c), lambda i, j: (i, j))

    kernel = _make_kernel(use_dropout)

    if use_dropout:
        keep = 1.0 - float(dropout_p)
        # TODO(synk): on real TPU hardware this mask could be generated in-kernel via
        # pltpu.prng_random_bits + an integer-threshold compare (saves the extra HBM
        # read), but prng_seed has no CPU-interpret lowering, so we precompute it.
        keep_mask = jax.random.bernoulli(key, keep, (B, C))
        mask = jnp.where(keep_mask, 1.0 / keep, 0.0).astype(x.dtype)
        in_specs = [x_spec, pe_spec, x_spec]
        args = (x2, pe2, mask)
    else:
        in_specs = [x_spec, pe_spec]
        args = (x2, pe2)

    out2 = pl.pallas_call(
        kernel,
        out_shape=jax.ShapeDtypeStruct((B, C), x.dtype),
        grid=grid,
        in_specs=in_specs,
        out_specs=out_spec,
        compiler_params=pltpu.CompilerParams(
            dimension_semantics=("parallel", "parallel"),
        ),
    )(*args)

    return out2.reshape(B, S, D)


if __name__ == "__main__":
    # Module config: d_model=32, seq_len=8, dropout_value=0.1
    d_model, seq_len, dropout_value = 32, 8, 0.1
    batch = 2

    key = jax.random.PRNGKey(0)
    kx, kdrop = jax.random.split(key)
    x = jax.random.normal(kx, (batch, seq_len, d_model), dtype=jnp.float32)
    pe = _build_pe(seq_len, d_model)

    # Eval-mode forward (dropout is identity), matching module.eval() semantics.
    out = positional_encoding(x, pe, kdrop, dropout_p=dropout_value, training=False)
    out = jax.block_until_ready(out)

    ref = x + pe[None, :seq_len, :]
    assert jnp.allclose(out, ref, atol=1e-6), "mismatch vs eval reference"

    # Training-mode forward (stochastic dropout): every element must be either 0
    # (dropped) or (x + pe) / keep (kept).
    out_train = positional_encoding(x, pe, kdrop, dropout_p=dropout_value, training=True)
    out_train = jax.block_until_ready(out_train)

    scaled = ref / (1.0 - dropout_value)
    ok = jnp.isclose(out_train, 0.0, atol=1e-6) | jnp.isclose(
        out_train, scaled, rtol=1e-5, atol=1e-6
    )
    assert bool(jnp.all(ok)), "dropout output not in {0, (x+pe)/keep}"

    print("KERNEL_OK")
</pallas_src>

<mosaic_0001>
module attributes {stable_mosaic.version = 11 : i64} {
  func.func @kernel(%arg0: i32, %arg1: i32, %arg2: memref<2x256xf32, #tpu.memory_space<vmem>>, %arg3: memref<1x256xf32, #tpu.memory_space<vmem>>, %arg4: memref<2x256xf32, #tpu.memory_space<vmem>>) attributes {dimension_semantics = [#tpu.dimension_semantics<parallel>, #tpu.dimension_semantics<parallel>], iteration_bounds = array<i64: 1, 1>, scalar_prefetch = 0 : i64, scratch_operands = 0 : i64, tpu.core_type = #tpu.core_type<tc>, window_params = [{transform_indices = @transform_0, window_bounds = array<i64: 2, 256>}, {transform_indices = @transform_1, window_bounds = array<i64: 1, 256>}, {transform_indices = @transform_2, window_bounds = array<i64: 2, 256>}]} {
    %c0 = arith.constant 0 : index
    %c0_0 = arith.constant 0 : index
    %0 = vector.load %arg2[%c0, %c0_0] : memref<2x256xf32, #tpu.memory_space<vmem>>, vector<2x256xf32>
    %c0_1 = arith.constant 0 : index
    %c0_2 = arith.constant 0 : index
    %1 = vector.load %arg3[%c0_1, %c0_2] : memref<1x256xf32, #tpu.memory_space<vmem>>, vector<1x256xf32>
    %2 = vector.broadcast %1 : vector<1x256xf32> to vector<2x256xf32>
    %3 = arith.addf %0, %2 : vector<2x256xf32>
    %c0_3 = arith.constant 0 : index
    %c0_4 = arith.constant 0 : index
    %4 = vector.load %arg4[%c0_3, %c0_4] : memref<2x256xf32, #tpu.memory_space<vmem>>, vector<2x256xf32>
    tpu.vector_store %arg4[%c0_3, %c0_4], %3 {strides = array<i32>} : memref<2x256xf32, #tpu.memory_space<vmem>>, vector<2x256xf32>,
    return
  }
  func.func @transform_0(%arg0: i32, %arg1: i32) -> (i32, i32) {
    %c0_i32 = arith.constant 0 : i32
    return %arg0, %arg1 : i32, i32
  }
  func.func @transform_1(%arg0: i32, %arg1: i32) -> (i32, i32) {
    %c0_i32 = arith.constant 0 : i32
    %c0_i32_0 = arith.constant 0 : i32
    return %c0_i32, %arg1 : i32, i32
  }
  func.func @transform_2(%arg0: i32, %arg1: i32) -> (i32, i32) {
    %c0_i32 = arith.constant 0 : i32
    return %arg0, %arg1 : i32, i32
  }
}

</mosaic_0001>

<bundles_post_ra>
// kernel: positional_encoding.1
= control target key start
LH: loop header
LB: loop body
LE: loop exit
PB: predicated region body
PF: predicated region fallthrough
CT: control target
= control target key end

     0   :  { %v14_v0 = vlaneseq  ;;  %v38_v1 = vmov 1983009808   ;;  %s63_s1 = inlined_call_operand.vmem [shape: f32[1,256], index: 1, kind: input, shape index: {}]   ;;  %s64_s0 = inlined_call_operand.vmem [shape: f32[2,256], index: 0, kind: input, shape index: {}]   ;;  %s65_s2 = inlined_call_operand.vmem [shape: f32[2,256], index: 2, kind: output, shape index: {}]  }
   0x1   :  { %v24_v2 = vunpack.c.l.s4 %v38_v1  ;;  %v12_v4 = vld [vmem:[%s63_s1] sm:$0x3] }
   0x2   :  { %v15_v3 = vshrl.u32 %v14_v0, 7  ;;  %v11_v12 = vld [vmem:[%s64_s0] sm:$0xf] }
   0x3   :  { %v25_v5 = vunpack.c.0.s8 %v24_v2 }
   0x4   :  { %v16_v6 = vsub.s32 0, %v15_v3  ;;  %v20_v7 = vsub.s32 1, %v15_v3 }
   0x5   :  { %v28_v10 = vsub.s32 %v25_v5, %v15_v3 }
   0x6   :  { %v17_v8 = vrot.slane %v12_v4, %v16_v6  ;;  %v21_v9 = vrot.slane %v12_v4, %v20_v7 }
   0x8   :  { %v22_v11 = vcombine.low %v17_v8, %v21_v9 }
   0xa   :  { %v29_v13 = vrot.slane %v22_v11, %v28_v10 }
   0xc   :  { %v31_v14 = vadd.f32 %v29_v13, %v11_v12 }
   0xe   :  { %32 = vst [vmem:[%s65_s2] sm:$0xf] %v31_v14 }

</bundles_post_ra>
